<compile_context>
chip_gen: v7x
topology: tpu7x:2x2x1
jax: 0.10.0
libtpu: 0.0.40
codegen_flags: <defaults>
</compile_context>

<pallas_src>
import jax
import jax.numpy as jnp
from jax.experimental import pallas as pl
from jax.experimental.pallas import tpu as pltpu


def _round_up(x, m):
    return ((x + m - 1) // m) * m


def _head_kernel(xf_ref, xs_ref, wbig_ref, ws_ref, b_ref, out_ref):
    """Fused [Dropout(eval) -> 1x1 conv -> avg-pool -> concat -> Linear] for one batch tile.

    xf_ref  : (TN, HW*C)   backbone feature-map tile (channels-last, spatially flat)
    xs_ref  : (TN, S)      superclass inputs
    wbig_ref: (HW*C, Kp)   tiled + 1/HW-scaled fused weight (mean folded into weights)
    ws_ref  : (S, Kp)      superclass slice of the concat-Linear weight
    b_ref   : (1, Kp)      fused bias
    out_ref : (TN, Kp)
    """
    acc = jnp.dot(xf_ref[...], wbig_ref[...], preferred_element_type=jnp.float32)
    acc = acc + jnp.dot(xs_ref[...], ws_ref[...], preferred_element_type=jnp.float32)
    out_ref[...] = (acc + b_ref[...]).astype(out_ref.dtype)


def subclass_model_forward(x_feat, x_superclass, params, *, tn=None, feature_dtype=None):
    """x_feat: (N, HW, C) backbone feature map (channels-last, spatially flat).
       x_superclass: (N, S) float32.
       Returns (N, K) float32 subclass logits."""
    N, HW, C = x_feat.shape
    S = x_superclass.shape[1]
    w_conv_t = params["w_conv_t"]   # (C, K)   Conv2d(C,K,1) weight pre-transposed
    b_conv = params["b_conv"]       # (1, K)
    w_cat_t = params["w_cat_t"]     # (K+S, K) Linear(K+S,K) weight pre-transposed
    b_cat = params["b_cat"]         # (1, K)
    K = w_conv_t.shape[1]
    Kp = _round_up(K, 128)          # pad K to full 128-lane width -> unmasked stores

    # --- Offline algebraic fusion (exact up to fp32 summation order) ------------------
    # out = mean_hw(x @ w_conv_t + b_conv) @ w_cat_t[:K] + sup @ w_cat_t[K:] + b_cat
    #     = x2d @ W_big + sup @ W_sup + b_fused       with x2d = x.reshape(N, HW*C)
    w_fused = w_conv_t @ w_cat_t[:K]                               # (C, K)
    w_big = jnp.tile(w_fused, (HW, 1)) * jnp.float32(1.0 / HW)     # (HW*C, K), mean folded
    w_sup = w_cat_t[K:]                                            # (S, K)
    b_fused = b_conv @ w_cat_t[:K] + b_cat                         # (1, K)

    # Zero-pad K -> Kp; padded output lanes are zero and sliced off below.
    w_big = jnp.pad(w_big, ((0, 0), (0, Kp - K)))
    w_sup = jnp.pad(w_sup, ((0, 0), (0, Kp - K)))
    b_fused = jnp.pad(b_fused, ((0, 0), (0, Kp - K)))

    # --- dtypes -------------------------------------------------------------------------
    feat_dtype = jnp.dtype(feature_dtype) if feature_dtype is not None else jnp.dtype(x_feat.dtype)
    x_feat2d = x_feat.reshape(N, HW * C).astype(feat_dtype)   # free reshape, contiguous
    w_big = w_big.astype(feat_dtype)                          # bf16 feeds MXU directly
    x_superclass = x_superclass.astype(jnp.float32)
    w_sup = w_sup.astype(jnp.float32)
    b_fused = b_fused.astype(jnp.float32)

    feat_itemsize = feat_dtype.itemsize
    sub = 16 if feat_itemsize < 4 else 8          # sublane multiple for the feature dtype
    row_bytes = HW * C * feat_itemsize

    # --- Per-chip VMEM budget & batch-tile size -----------------------------------------
    try:
        vmem_cap = int(pltpu.get_tpu_info().vmem_capacity_bytes)   # 128 MiB v5e/v6e, 64 MiB v7x
    except Exception:
        vmem_cap = 64 << 20                                        # conservative fallback
    scoped_target = vmem_cap // 2                                  # headroom for compiler scratch

    weight_bytes = HW * C * Kp * feat_itemsize + (S * Kp + Kp) * 4
    # Cost per extra batch row: double-buffered feat + sup input blocks and out block.
    per_row_bytes = 2 * (row_bytes + S * 4 + Kp * 4)

    n_rounded = _round_up(N, sub)
    if tn is None:
        cap = (scoped_target - 2 * weight_bytes) // per_row_bytes
        cap = max(sub, min(1024, (cap // sub) * sub))
        tn = min(cap, n_rounded)
        # Keep >= 2 grid steps for large N so both v7x TensorCores get work.
        if n_rounded >= 512:
            tn = min(tn, max(256, _round_up(pl.cdiv(n_rounded, 2), sub)))
    else:
        tn = max(sub, _round_up(min(tn, n_rounded), sub))

    n_pad = pl.cdiv(N, tn) * tn
    if n_pad != N:
        # Padded rows only produce extra (bias-only) output rows, sliced off below.
        x_feat2d = jnp.pad(x_feat2d, ((0, n_pad - N), (0, 0)))
        x_superclass = jnp.pad(x_superclass, ((0, n_pad - N), (0, 0)))

    grid = (n_pad // tn,)

    # Explicit scoped-VMEM limit sized for the chosen tile (double-buffered blocks +
    # weights), clamped below physical.  v5e's 16 MiB default would otherwise bind.
    vmem_need = tn * per_row_bytes + 2 * weight_bytes
    vmem_limit = min(max(32 << 20, int(vmem_need * 1.3) + (2 << 20)), int(vmem_cap * 0.9))

    flops = 2 * n_pad * HW * C * Kp + 2 * n_pad * S * Kp + n_pad * Kp
    bytes_accessed = (n_pad * row_bytes + n_pad * S * 4 + weight_bytes + n_pad * Kp * 4)

    out = pl.pallas_call(
        _head_kernel,
        out_shape=jax.ShapeDtypeStruct((n_pad, Kp), jnp.float32),
        grid_spec=pltpu.PrefetchScalarGridSpec(
            num_scalar_prefetch=0,
            grid=grid,
            in_specs=[
                pl.BlockSpec((tn, HW * C), lambda i: (i, 0)),
                pl.BlockSpec((tn, S), lambda i: (i, 0)),
                pl.BlockSpec((HW * C, Kp), lambda i: (0, 0)),
                pl.BlockSpec((S, Kp), lambda i: (0, 0)),
                pl.BlockSpec((1, Kp), lambda i: (0, 0)),
            ],
            out_specs=pl.BlockSpec((tn, Kp), lambda i: (i, 0)),
        ),
        compiler_params=pltpu.CompilerParams(
            dimension_semantics=("parallel",),
            vmem_limit_bytes=vmem_limit),
        cost_estimate=pl.CostEstimate(
            flops=flops, transcendentals=0, bytes_accessed=bytes_accessed),
    )(x_feat2d, x_superclass, w_big, w_sup, b_fused)

    return out[:N, :K]


def _reference(x_feat, x_superclass, params):
    """Plain-JAX reference of the original (unfused) forward semantics."""
    p = jnp.einsum("nsc,ck->nsk", x_feat, params["w_conv_t"]) + params["b_conv"]
    base = jnp.mean(p, axis=1)                                   # (N, K) pooled conv head
    cat = jnp.concatenate([base, x_superclass], axis=1)          # (N, K+S)
    return cat @ params["w_cat_t"] + params["b_cat"]             # (N, K)


if __name__ == "__main__":
    # Small, deterministic shapes consistent with the module:
    #   num_subclasses K = 8, num_superclasses S = 4,
    #   backbone feature map: N=2, C=128 channels, 4x4 spatial -> HW=16.
    N, C, H, W = 2, 128, 4, 4
    HW = H * W
    K, S = 8, 4

    key = jax.random.PRNGKey(0)
    k1, k2, k3, k4, k5, k6 = jax.random.split(key, 6)

    x_feat = jax.random.normal(k1, (N, HW, C), dtype=jnp.float32)
    x_superclass = jax.random.normal(k2, (N, S), dtype=jnp.float32)

    params = {
        # Conv2d(C, K, kernel_size=1) weight (K, C, 1, 1) -> pre-transposed (C, K)
        "w_conv_t": 0.02 * jax.random.normal(k3, (C, K), dtype=jnp.float32),
        "b_conv": 0.01 * jax.random.normal(k4, (1, K), dtype=jnp.float32),
        # nn.Linear(S + K, K) weight (K, K+S) -> pre-transposed (K+S, K)
        "w_cat_t": 0.1 * jax.random.normal(k5, (K + S, K), dtype=jnp.float32),
        "b_cat": 0.01 * jax.random.normal(k6, (1, K), dtype=jnp.float32),
    }

    ref = _reference(x_feat, x_superclass, params)

    # f32 path (default)
    out = subclass_model_forward(x_feat, x_superclass, params)
    out = jax.block_until_ready(out)
    assert out.shape == (N, K)
    assert jnp.allclose(out, ref, atol=1e-4, rtol=1e-4)

    # bf16 feature-map path (halves HBM traffic; f32 accumulation on the MXU)
    out_bf16 = subclass_model_forward(x_feat, x_superclass, params,
                                      feature_dtype=jnp.bfloat16)
    out_bf16 = jax.block_until_ready(out_bf16)
    assert out_bf16.shape == (N, K)
    assert jnp.allclose(out_bf16, ref, atol=2e-2, rtol=2e-2)

    # Exercise multi-step grid + batch padding (N not a multiple of the tile).
    N2 = 37
    kk1, kk2 = jax.random.split(jax.random.PRNGKey(1), 2)
    xf2 = jax.random.normal(kk1, (N2, HW, C), dtype=jnp.float32)
    xs2 = jax.random.normal(kk2, (N2, S), dtype=jnp.float32)
    out2 = jax.block_until_ready(subclass_model_forward(xf2, xs2, params, tn=16))
    ref2 = _reference(xf2, xs2, params)
    assert out2.shape == (N2, K)
    assert jnp.allclose(out2, ref2, atol=1e-4, rtol=1e-4)

    print("KERNEL_OK")
</pallas_src>

<mosaic_0001>
module attributes {stable_mosaic.version = 11 : i64} {
  func.func @_head_kernel(%arg0: i32, %arg1: memref<8x2048xf32, #tpu.memory_space<vmem>>, %arg2: memref<8x4xf32, #tpu.memory_space<vmem>>, %arg3: memref<2048x128xf32, #tpu.memory_space<vmem>>, %arg4: memref<4x128xf32, #tpu.memory_space<vmem>>, %arg5: memref<1x128xf32, #tpu.memory_space<vmem>>, %arg6: memref<8x128xf32, #tpu.memory_space<vmem>>) attributes {dimension_semantics = [#tpu.dimension_semantics<parallel>], iteration_bounds = array<i64: 1>, scalar_prefetch = 0 : i64, scratch_operands = 0 : i64, tpu.core_type = #tpu.core_type<tc>, window_params = [{transform_indices = @transform_0, window_bounds = array<i64: 8, 2048>}, {transform_indices = @transform_1, window_bounds = array<i64: 8, 4>}, {pipeline_mode = #tpu.pipeline_mode<synchronous>, transform_indices = @transform_2, window_bounds = array<i64: 2048, 128>}, {pipeline_mode = #tpu.pipeline_mode<synchronous>, transform_indices = @transform_3, window_bounds = array<i64: 4, 128>}, {pipeline_mode = #tpu.pipeline_mode<synchronous>, transform_indices = @transform_4, window_bounds = array<i64: 1, 128>}, {transform_indices = @transform_5, window_bounds = array<i64: 8, 128>}]} {
    %c0 = arith.constant 0 : index
    %c0_0 = arith.constant 0 : index
    %0 = vector.load %arg1[%c0, %c0_0] : memref<8x2048xf32, #tpu.memory_space<vmem>>, vector<8x2048xf32>
    %c0_1 = arith.constant 0 : index
    %c0_2 = arith.constant 0 : index
    %1 = vector.load %arg3[%c0_1, %c0_2] : memref<2048x128xf32, #tpu.memory_space<vmem>>, vector<2048x128xf32>
    %cst = arith.constant dense<0.000000e+00> : vector<8x128xf32>
    %2 = tpu.matmul %0, %1, %cst {dimension_numbers = #tpu.dot_dimension_numbers<[1], [0], [0], [1], [0, 0, 1, 1], [], []>} : vector<8x2048xf32>, vector<2048x128xf32>, vector<8x128xf32> -> vector<8x128xf32>
    %c0_3 = arith.constant 0 : index
    %c0_4 = arith.constant 0 : index
    %3 = vector.load %arg2[%c0_3, %c0_4] : memref<8x4xf32, #tpu.memory_space<vmem>>, vector<8x4xf32>
    %c0_5 = arith.constant 0 : index
    %c0_6 = arith.constant 0 : index
    %4 = vector.load %arg4[%c0_5, %c0_6] : memref<4x128xf32, #tpu.memory_space<vmem>>, vector<4x128xf32>
    %cst_7 = arith.constant dense<0.000000e+00> : vector<8x128xf32>
    %5 = tpu.matmul %3, %4, %cst_7 {dimension_numbers = #tpu.dot_dimension_numbers<[1], [0], [0], [1], [0, 0, 1, 1], [], []>} : vector<8x4xf32>, vector<4x128xf32>, vector<8x128xf32> -> vector<8x128xf32>
    %6 = arith.addf %2, %5 : vector<8x128xf32>
    %c0_8 = arith.constant 0 : index
    %c0_9 = arith.constant 0 : index
    %7 = vector.load %arg5[%c0_8, %c0_9] : memref<1x128xf32, #tpu.memory_space<vmem>>, vector<1x128xf32>
    %8 = vector.broadcast %7 : vector<1x128xf32> to vector<8x128xf32>
    %9 = arith.addf %6, %8 : vector<8x128xf32>
    %c0_10 = arith.constant 0 : index
    %c0_11 = arith.constant 0 : index
    %10 = vector.load %arg6[%c0_10, %c0_11] : memref<8x128xf32, #tpu.memory_space<vmem>>, vector<8x128xf32>
    tpu.vector_store %arg6[%c0_10, %c0_11], %9 {strides = array<i32>} : memref<8x128xf32, #tpu.memory_space<vmem>>, vector<8x128xf32>,
    return
  }
  func.func @transform_0(%arg0: i32) -> (i32, i32) {
    %c0_i32 = arith.constant 0 : i32
    %c0_i32_0 = arith.constant 0 : i32
    return %arg0, %c0_i32 : i32, i32
  }
  func.func @transform_1(%arg0: i32) -> (i32, i32) {
    %c0_i32 = arith.constant 0 : i32
    %c0_i32_0 = arith.constant 0 : i32
    return %arg0, %c0_i32 : i32, i32
  }
  func.func @transform_2(%arg0: i32) -> (i32, i32) {
    %c0_i32 = arith.constant 0 : i32
    %c0_i32_0 = arith.constant 0 : i32
    %c0_i32_1 = arith.constant 0 : i32
    return %c0_i32, %c0_i32_0 : i32, i32
  }
  func.func @transform_3(%arg0: i32) -> (i32, i32) {
    %c0_i32 = arith.constant 0 : i32
    %c0_i32_0 = arith.constant 0 : i32
    %c0_i32_1 = arith.constant 0 : i32
    return %c0_i32, %c0_i32_0 : i32, i32
  }
  func.func @transform_4(%arg0: i32) -> (i32, i32) {
    %c0_i32 = arith.constant 0 : i32
    %c0_i32_0 = arith.constant 0 : i32
    %c0_i32_1 = arith.constant 0 : i32
    return %c0_i32, %c0_i32_0 : i32, i32
  }
  func.func @transform_5(%arg0: i32) -> (i32, i32) {
    %c0_i32 = arith.constant 0 : i32
    %c0_i32_0 = arith.constant 0 : i32
    return %arg0, %c0_i32 : i32, i32
  }
}

</mosaic_0001>

<bundles_post_ra>
// kernel: tpu_custom_call.1
= control target key start
LH: loop header
LB: loop body
LE: loop exit
PB: predicated region body
PF: predicated region fallthrough
CT: control target
= control target key end

     0   :  { %10 = vsyncpa [#allocation3], 0  ;;  %s1698_s0 = inlined_call_operand.hbm [shape: f32[8,2048], index: 0, kind: input, shape index: {}]   ;;  %s1699_s1 = inlined_call_operand.vmem [shape: f32[8,4], index: 1, kind: input, shape index: {}]   ;;  %s1700_s2 = inlined_call_operand.hbm [shape: f32[2048,128], index: 2, kind: input, shape index: {}]   ;;  %s1701_s3 = inlined_call_operand.vmem [shape: f32[4,128], index: 3, kind: input, shape index: {}]   ;;  %s1702_s4 = inlined_call_operand.vmem [shape: f32[1,128], index: 4, kind: input, shape index: {}]   ;;  %s1703_s5 = inlined_call_operand.hbm [shape: f32[8,128], index: 5, kind: output, shape index: {}]  }
   0x1   :  { %11 = vsyncpa [#allocation6], 0 }
   0x2   :  { %12 = vsyncpa [#allocation4], 0  ;;  %s1609_s18 = smov [#allocation2]   ;;  %s1610_s20 = smov [#allocation5]  }
   0x3   :  { %s19_s19 = sshll.u32 %s1609_s18, 4  ;;  %s30_s21 = sshll.u32 %s1610_s20, 4  ;;  %s20_s19 = int_to_ptr.vmem [resolvable:$true] %s19_s19  ;;  %s1646_s21 = int_to_ptr.vmem [resolvable:$true] %s30_s21 }
   0x4   :  { %s1537_s24 = scalar_lea.hbm %s1698_s0, 2048 }
   0x5   :  { %p1538_p0 = scmp.ne.s32.totalorder %s1698_s0, %s1537_s24  ;;  %p1541_p1 = scmp.lt.u32.totalorder %s1537_s24, %s1698_s0 }
   0x7   :  { %p1543_p2 = pnand %p1541_p1, %p1538_p0 }
   0x9   :  { %1546 = shalt.err (!%p1543_p2)
}
   0xa   :  { %s1547_s29 = scalar_lea.vmem %s20_s19, 2048  ;;  %p1552_p4 = scmp.lt.s32.totalorder %s20_s19, %s20_s19 }
   0xb   :  { %p1548_p3 = scmp.ne.s32.totalorder %s20_s19, %s1547_s29  ;;  %p1553_p5 = scmp.lt.s32.totalorder %s1547_s29, %s1547_s29 }
   0xd   :  { %p1554_p6 = por %p1553_p5, %p1552_p4 }
   0xf   :  { %p1555_p7 = pnand %p1554_p6, %p1548_p3 }
  0x11   :  { %1558 = shalt.err (!%p1555_p7)
}
  0x12   :  { %22 = dma.hbm_to_vmem [thread:$0]  %s1698_s0, 2048, %s20_s19, [#allocation3]  }
  0x13   :  { %s1559_s9 = scalar_lea.hbm %s1700_s2, 32768 }
  0x14   :  { %p1560_p8 = scmp.ne.s32.totalorder %s1700_s2, %s1559_s9  ;;  %p1563_p9 = scmp.lt.u32.totalorder %s1559_s9, %s1700_s2 }
  0x16   :  { %p1565_p10 = pnand %p1563_p9, %p1560_p8 }
  0x18   :  { %1568 = shalt.err (!%p1565_p10)
}
  0x19   :  { %s1569_s14 = scalar_lea.vmem %s1646_s21, 32768  ;;  %p1574_p12 = scmp.lt.s32.totalorder %s1646_s21, %s1646_s21 }
  0x1a   :  { %p1570_p11 = scmp.ne.s32.totalorder %s1646_s21, %s1569_s14  ;;  %p1575_p13 = scmp.lt.s32.totalorder %s1569_s14, %s1569_s14 }
  0x1c   :  { %p1576_p0 = por %p1575_p13, %p1574_p12 }
  0x1e   :  { %p1577_p1 = pnand %p1576_p0, %p1570_p11 }
  0x20   :  { %1580 = shalt.err (!%p1577_p1)
}
  0x21   :  { %s1611_s0 = smov 128   ;;  %s1612_s15 = smov 8  }
  0x22   :  { %36 = dma.hbm_to_vmem [thread:$0]  %s1700_s2, 32768, %s1646_s21, [#allocation6], %s1611_s0, %s1611_s0, %s1612_s15  }
  0x23   :  { %1603 = dma.done.wait [#allocation3], 2048  }
  0x24   :  { %1604 = vsyncadd [#allocation3], 4294965248 }
  0x25   :  { %1605 = dma.done.wait [#allocation6], 32768  }
  0x26   :  { %1606 = vsyncadd [#allocation6], 4294934528  ;;  %v1613_v0 = vmov 0.0   ;;  %vm1614_vm0 = vmmov 0   ;;  %vm325_vm1 = vcmask 1043456   ;;  %v79_v2 = vld [vmem:[#allocation5 + $0x80] sm:$0xff] }
  0x27   :  { %1269 = vmatprep.subr.mxu0 %v1613_v0  ;;  %1271 = vmatprep.mubr.msk.f32.mxu0 %vm1614_vm0, %v1613_v0  ;;  %v320_v1 = vld [vmem:[%s1701_s3] sm:$0xf]  ;;  %v80_v3 = vld [vmem:[#allocation5 + $0x88] sm:$0xff]  ;;  %vm321_vm2 = vcmask 31744   ;;  %v81_v14 = vld [vmem:[#allocation5 + $0x90] sm:$0xff]  ;;  %s1615_s21 = smov [#allocation7]  }
  0x28   :  { %1270 = vmatpush3.msk.msra.mxu0 %vm325_vm1, %v320_v1  ;;  %v1274_v4 = vpack.c.bf16 %v80_v3, %v79_v2  ;;  %v63_v5 = vld [vmem:[#allocation5] sm:$0xff]  ;;  %v64_v6 = vld [vmem:[#allocation5 + $0x8] sm:$0xff]  ;;  %v82_v15 = vld [vmem:[#allocation5 + $0x98] sm:$0xff]  ;;  %s974_s22 = sshll.u32 %s1615_s21, 4  ;;  %s975_s22 = int_to_ptr.vmem [resolvable:$true] %s974_s22 }
  0x29   :  { %v111_v7 = vld [vmem:[#allocation5 + $0x180] sm:$0xff]  ;;  %v1276_v8 = vpack.c.bf16 %v64_v6, %v63_v5  ;;  %v112_v9 = vld [vmem:[#allocation5 + $0x188] sm:$0xff]  ;;  %v1278_v17 = vpack.c.bf16 %v82_v15, %v81_v14  ;;  %v65_v18 = vld [vmem:[#allocation5 + $0x10] sm:$0xff]  ;;  %s1581_s23 = scalar_lea.vmem %s975_s22, 128  ;;  %p1586_p3 = scmp.lt.s32.totalorder %s975_s22, %s975_s22 }
  0x2a   :  { %v319_v10 = vld [vmem:[%s1699_s1] sm:$0xff]  ;;  %1275 = vmatprep.subr.bf16.mxu1 %v1274_v4  ;;  %v1306_v12 = vpack.c.bf16 %v112_v9, %v111_v7  ;;  %v96_v13 = vld [vmem:[#allocation5 + $0x108] sm:$0xff]  ;;  %v66_v19 = vld [vmem:[#allocation5 + $0x18] sm:$0xff]  ;;  %p1582_p2 = scmp.ne.s32.totalorder %s975_s22, %s1581_s23  ;;  %p1587_p4 = scmp.lt.s32.totalorder %s1581_s23, %s1581_s23 }
  0x2b   :  { %v95_v11 = vld [vmem:[#allocation5 + $0x100] sm:$0xff]  ;;  %1272 = vmatmul.mubr.msk.f32.vlgmr.msra.gmra.mrb[0].mxu0 %vm321_vm2, %v319_v10  ;;  %1277 = vmatpush3.bf16.msra.mxu1 %v1276_v8  ;;  %v113_v20 = vld [vmem:[#allocation5 + $0x190] sm:$0xff]  ;;  %v1280_v21 = vpack.c.bf16 %v66_v19, %v65_v18  ;;  %v114_v22 = vld [vmem:[#allocation5 + $0x198] sm:$0xff] }
  0x2c   :  { %v1308_v16 = vpack.c.bf16 %v96_v13, %v95_v11  ;;  %1307 = vmatprep.subr.bf16.mxu0 %v1306_v12  ;;  %v97_v23 = vld [vmem:[#allocation5 + $0x110] sm:$0xff]  ;;  %v98_v24 = vld [vmem:[#allocation5 + $0x118] sm:$0xff]  ;;  %1279 = vmatprep.subr.bf16.mxu1 %v1278_v17  ;;  %v1310_v25 = vpack.c.bf16 %v114_v22, %v113_v20  ;;  %v83_v27 = vld [vmem:[#allocation5 + $0xa0] sm:$0xff]  ;;  %p1588_p5 = por %p1587_p4, %p1586_p3 }
  0x2d   :  { %v1312_v26 = vpack.c.bf16 %v98_v24, %v97_v23  ;;  %v84_v28 = vld [vmem:[#allocation5 + $0xa8] sm:$0xff]  ;;  %v67_v29 = vld [vmem:[#allocation5 + $0x20] sm:$0xff]  ;;  %v85_v38 = vld [vmem:[#allocation5 + $0xb0] sm:$0xff] }
  0x2e   :  { %1309 = vmatpush3.bf16.msra.mxu0 %v1308_v16  ;;  %v1282_v30 = vpack.c.bf16 %v84_v28, %v83_v27  ;;  %v68_v31 = vld [vmem:[#allocation5 + $0x28] sm:$0xff]  ;;  %v115_v32 = vld [vmem:[#allocation5 + $0x1a0] sm:$0xff]  ;;  %v86_v39 = vld [vmem:[#allocation5 + $0xb8] sm:$0xff]  ;;  %p1589_p6 = pnand %p1588_p5, %p1582_p2 }
  0x2f   :  { %v116_v33 = vld [vmem:[#allocation5 + $0x1a8] sm:$0xff]  ;;  %1281 = vmatpush3.bf16.msra.mxu1 %v1280_v21  ;;  %1311 = vmatprep.subr.bf16.mxu0 %v1310_v25  ;;  %v1284_v34 = vpack.c.bf16 %v68_v31, %v67_v29  ;;  %v99_v36 = vld [vmem:[#allocation5 + $0x120] sm:$0xff]  ;;  %v69_v40 = vld [vmem:[#allocation5 + $0x30] sm:$0xff]  ;;  %v1286_v43 = vpack.c.bf16 %v86_v39, %v85_v38 }
  0x30   :  { %v1314_v35 = vpack.c.bf16 %v116_v33, %v115_v32  ;;  %v100_v37 = vld [vmem:[#allocation5 + $0x128] sm:$0xff]  ;;  %1283 = vmatprep.subr.bf16.mxu1 %v1282_v30  ;;  %v70_v41 = vld [vmem:[#allocation5 + $0x38] sm:$0xff]  ;;  %v117_v44 = vld [vmem:[#allocation5 + $0x1b0] sm:$0xff] }
  0x31   :  { %v1316_v42 = vpack.c.bf16 %v100_v37, %v99_v36  ;;  %v118_v45 = vld [vmem:[#allocation5 + $0x1b8] sm:$0xff]  ;;  %v101_v46 = vld [vmem:[#allocation5 + $0x130] sm:$0xff]  ;;  %v87_v49 = vld [vmem:[#allocation5 + $0xc0] sm:$0xff]  ;;  %v1288_v51 = vpack.c.bf16 %v70_v41, %v69_v40 }
  0x32   :  { %1313 = vmatpush3.bf16.msra.mxu0 %v1312_v26  ;;  %v1318_v47 = vpack.c.bf16 %v118_v45, %v117_v44  ;;  %v102_v48 = vld [vmem:[#allocation5 + $0x138] sm:$0xff]  ;;  %v88_v50 = vld [vmem:[#allocation5 + $0xc8] sm:$0xff]  ;;  %v119_v52 = vld [vmem:[#allocation5 + $0x1c0] sm:$0xff] }
  0x33   :  { %1315 = vmatprep.subr.bf16.mxu0 %v1314_v35  ;;  %1285 = vmatpush3.bf16.msra.mxu1 %v1284_v34  ;;  %v1290_v53 = vpack.c.bf16 %v88_v50, %v87_v49  ;;  %v71_v54 = vld [vmem:[#allocation5 + $0x40] sm:$0xff]  ;;  %v72_v55 = vld [vmem:[#allocation5 + $0x48] sm:$0xff]  ;;  %v1320_v57 = vpack.c.bf16 %v102_v48, %v101_v46  ;;  %v89_v58 = vld [vmem:[#allocation5 + $0xd0] sm:$0xff] }
  0x34   :  { %1287 = vmatprep.subr.bf16.mxu1 %v1286_v43  ;;  %v120_v56 = vld [vmem:[#allocation5 + $0x1c8] sm:$0xff]  ;;  %v90_v59 = vld [vmem:[#allocation5 + $0xd8] sm:$0xff]  ;;  %v103_v61 = vld [vmem:[#allocation5 + $0x140] sm:$0xff]  ;;  %v1292_v63 = vpack.c.bf16 %v72_v55, %v71_v54 }
  0x35   :  { %v1322_v60 = vpack.c.bf16 %v120_v56, %v119_v52  ;;  %v104_v62 = vld [vmem:[#allocation5 + $0x148] sm:$0xff]  ;;  %v121_v0 = vld [vmem:[#allocation5 + $0x1d0] sm:$0xff]  ;;  %v122_v1 = vld [vmem:[#allocation5 + $0x1d8] sm:$0xff]  ;;  %v1294_v2 = vpack.c.bf16 %v90_v59, %v89_v58 }
  0x36   :  { %1317 = vmatpush3.bf16.msra.mxu0 %v1316_v42  ;;  %v73_v3 = vld [vmem:[#allocation5 + $0x50] sm:$0xff]  ;;  %v74_v4 = vld [vmem:[#allocation5 + $0x58] sm:$0xff]  ;;  %v1324_v5 = vpack.c.bf16 %v104_v62, %v103_v61  ;;  %v91_v6 = vld [vmem:[#allocation5 + $0xe0] sm:$0xff]  ;;  %v1326_v8 = vpack.c.bf16 %v122_v1, %v121_v0 }
  0x37   :  { %1319 = vmatprep.subr.bf16.mxu0 %v1318_v47  ;;  %1289 = vmatpush3.bf16.msra.mxu1 %v1288_v51  ;;  %v92_v7 = vld [vmem:[#allocation5 + $0xe8] sm:$0xff]  ;;  %v105_v9 = vld [vmem:[#allocation5 + $0x150] sm:$0xff]  ;;  %v106_v10 = vld [vmem:[#allocation5 + $0x158] sm:$0xff]  ;;  %v1296_v11 = vpack.c.bf16 %v74_v4, %v73_v3 }
  0x38   :  { %1291 = vmatprep.subr.bf16.mxu1 %v1290_v53  ;;  %v123_v12 = vld [vmem:[#allocation5 + $0x1e0] sm:$0xff]  ;;  %v124_v13 = vld [vmem:[#allocation5 + $0x1e8] sm:$0xff]  ;;  %v1298_v14 = vpack.c.bf16 %v92_v7, %v91_v6  ;;  %v1328_v17 = vpack.c.bf16 %v106_v10, %v105_v9  ;;  %v93_v18 = vld [vmem:[#allocation5 + $0xf0] sm:$0xff] }
  0x39   :  { %v75_v15 = vld [vmem:[#allocation5 + $0x60] sm:$0xff]  ;;  %v76_v16 = vld [vmem:[#allocation5 + $0x68] sm:$0xff]  ;;  %v94_v19 = vld [vmem:[#allocation5 + $0xf8] sm:$0xff]  ;;  %v1330_v21 = vpack.c.bf16 %v124_v13, %v123_v12 }
  0x3a   :  { %1321 = vmatpush3.bf16.msra.mxu0 %v1320_v57  ;;  %v48_v20 = vld [vmem:[#allocation2 + $0x8] sm:$0xff]  ;;  %v107_v22 = vld [vmem:[#allocation5 + $0x160] sm:$0xff]  ;;  %v50_v24 = vld [vmem:[#allocation2 + $0x18] sm:$0xff]  ;;  %v1300_v25 = vpack.c.bf16 %v76_v16, %v75_v15  ;;  %v1302_v28 = vpack.c.bf16 %v94_v19, %v93_v18 }
  0x3b   :  { %1323 = vmatprep.subr.bf16.mxu0 %v1322_v60  ;;  %1293 = vmatpush3.bf16.msra.mxu1 %v1292_v63  ;;  %v108_v23 = vld [vmem:[#allocation5 + $0x168] sm:$0xff]  ;;  %v125_v26 = vld [vmem:[#allocation5 + $0x1f0] sm:$0xff]  ;;  %v126_v27 = vld [vmem:[#allocation5 + $0x1f8] sm:$0xff] }
  0x3c   :  { %1295 = vmatprep.subr.bf16.mxu1 %v1294_v2  ;;  %463 = vmatprep.mubr.f32.mxu1 %v48_v20  ;;  %v77_v29 = vld [vmem:[#allocation5 + $0x70] sm:$0xff]  ;;  %v78_v30 = vld [vmem:[#allocation5 + $0x78] sm:$0xff]  ;;  %v1332_v31 = vpack.c.bf16 %v108_v23, %v107_v22  ;;  %v143_v32 = vld [vmem:[#allocation5 + $0x280] sm:$0xff]  ;;  %v1334_v34 = vpack.c.bf16 %v126_v27, %v125_v26 }
  0x3d   :  { %533 = vmatprep.mubr.f32.mxu0 %v50_v24  ;;  %v144_v33 = vld [vmem:[#allocation5 + $0x288] sm:$0xff]  ;;  %v109_v35 = vld [vmem:[#allocation5 + $0x170] sm:$0xff]  ;;  %v110_v36 = vld [vmem:[#allocation5 + $0x178] sm:$0xff]  ;;  %v1304_v37 = vpack.c.bf16 %v78_v30, %v77_v29 }
  0x3e   :  { %1325 = vmatpush3.bf16.msra.mxu0 %v1324_v5  ;;  %v175_v38 = vld [vmem:[#allocation5 + $0x380] sm:$0xff]  ;;  %v176_v39 = vld [vmem:[#allocation5 + $0x388] sm:$0xff]  ;;  %v1338_v40 = vpack.c.bf16 %v144_v33, %v143_v32  ;;  %v1336_v43 = vpack.c.bf16 %v110_v36, %v109_v35  ;;  %v145_v44 = vld [vmem:[#allocation5 + $0x290] sm:$0xff] }
  0x3f   :  { %1327 = vmatprep.subr.bf16.mxu0 %v1326_v8  ;;  %1297 = vmatpush3.bf16.msra.mxu1 %v1296_v11  ;;  %v127_v41 = vld [vmem:[#allocation5 + $0x200] sm:$0xff]  ;;  %v128_v42 = vld [vmem:[#allocation5 + $0x208] sm:$0xff]  ;;  %v146_v45 = vld [vmem:[#allocation5 + $0x298] sm:$0xff]  ;;  %v1370_v46 = vpack.c.bf16 %v176_v39, %v175_v38 }
  0x40   :  { %1299 = vmatprep.subr.bf16.mxu1 %v1298_v14  ;;  %v159_v47 = vld [vmem:[#allocation5 + $0x300] sm:$0xff]  ;;  %v160_v48 = vld [vmem:[#allocation5 + $0x308] sm:$0xff]  ;;  %v1340_v50 = vpack.c.bf16 %v128_v42, %v127_v41  ;;  %v177_v51 = vld [vmem:[#allocation5 + $0x390] sm:$0xff]  ;;  %v1342_v53 = vpack.c.bf16 %v146_v45, %v145_v44 }
  0x41   :  { %v47_v49 = vld [vmem:[#allocation2] sm:$0xff]  ;;  %v178_v52 = vld [vmem:[#allocation5 + $0x398] sm:$0xff]  ;;  %v129_v54 = vld [vmem:[#allocation5 + $0x210] sm:$0xff]  ;;  %v1372_v57 = vpack.c.bf16 %v160_v48, %v159_v47 }
  0x42   :  { %1329 = vmatpush3.bf16.msra.mxu0 %v1328_v17  ;;  %v130_v55 = vld [vmem:[#allocation5 + $0x218] sm:$0xff]  ;;  %v49_v56 = vld [vmem:[#allocation2 + $0x10] sm:$0xff]  ;;  %v147_v58 = vld [vmem:[#allocation5 + $0x2a0] sm:$0xff]  ;;  %v1374_v60 = vpack.c.bf16 %v178_v52, %v177_v51 }
  0x43   :  { %1331 = vmatprep.subr.bf16.mxu0 %v1330_v21  ;;  %1301 = vmatpush3.bf16.msra.mxu1 %v1300_v25  ;;  %v148_v59 = vld [vmem:[#allocation5 + $0x2a8] sm:$0xff]  ;;  %v161_v61 = vld [vmem:[#allocation5 + $0x310] sm:$0xff]  ;;  %v162_v62 = vld [vmem:[#allocation5 + $0x318] sm:$0xff]  ;;  %v1344_v63 = vpack.c.bf16 %v130_v55, %v129_v54 }
  0x44   :  { %1303 = vmatprep.subr.bf16.mxu1 %v1302_v28  ;;  %v179_v0 = vld [vmem:[#allocation5 + $0x3a0] sm:$0xff]  ;;  %v180_v1 = vld [vmem:[#allocation5 + $0x3a8] sm:$0xff]  ;;  %v1346_v2 = vpack.c.bf16 %v148_v59, %v147_v58  ;;  %v1376_v5 = vpack.c.bf16 %v162_v62, %v161_v61  ;;  %v149_v6 = vld [vmem:[#allocation5 + $0x2b0] sm:$0xff] }
  0x45   :  { %v131_v3 = vld [vmem:[#allocation5 + $0x220] sm:$0xff]  ;;  %v132_v4 = vld [vmem:[#allocation5 + $0x228] sm:$0xff]  ;;  %v150_v7 = vld [vmem:[#allocation5 + $0x2b8] sm:$0xff]  ;;  %v1378_v8 = vpack.c.bf16 %v180_v1, %v179_v0 }
  0x46   :  { %1333 = vmatpush3.bf16.msra.mxu0 %v1332_v31  ;;  %v163_v9 = vld [vmem:[#allocation5 + $0x320] sm:$0xff]  ;;  %v164_v10 = vld [vmem:[#allocation5 + $0x328] sm:$0xff]  ;;  %v1348_v11 = vpack.c.bf16 %v132_v4, %v131_v3  ;;  %v181_v12 = vld [vmem:[#allocation5 + $0x3b0] sm:$0xff]  ;;  %v1350_v14 = vpack.c.bf16 %v150_v7, %v149_v6 }
  0x47   :  { %1335 = vmatprep.subr.bf16.mxu0 %v1334_v34  ;;  %1305 = vmatpush3.bf16.msra.mxu1 %v1304_v37  ;;  %v182_v13 = vld [vmem:[#allocation5 + $0x3b8] sm:$0xff]  ;;  %v133_v15 = vld [vmem:[#allocation5 + $0x230] sm:$0xff]  ;;  %v1380_v17 = vpack.c.bf16 %v164_v10, %v163_v9  ;;  %v151_v18 = vld [vmem:[#allocation5 + $0x2c0] sm:$0xff] }
  0x48   :  { %1339 = vmatprep.subr.bf16.mxu1 %v1338_v40  ;;  %v134_v16 = vld [vmem:[#allocation5 + $0x238] sm:$0xff]  ;;  %v152_v19 = vld [vmem:[#allocation5 + $0x2c8] sm:$0xff]  ;;  %v1382_v20 = vpack.c.bf16 %v182_v13, %v181_v12  ;;  %v165_v21 = vld [vmem:[#allocation5 + $0x330] sm:$0xff] }
  0x49   :  { %v166_v22 = vld [vmem:[#allocation5 + $0x338] sm:$0xff]  ;;  %v1352_v23 = vpack.c.bf16 %v134_v16, %v133_v15  ;;  %v183_v24 = vld [vmem:[#allocation5 + $0x3c0] sm:$0xff]  ;;  %v184_v25 = vld [vmem:[#allocation5 + $0x3c8] sm:$0xff]  ;;  %v1354_v27 = vpack.c.bf16 %v152_v19, %v151_v18 }
  0x4a   :  { %1337 = vmatpush3.bf16.msra.mxu0 %v1336_v43  ;;  %464 = vmatmul.mubr.f32.vlgmr.msra.gmra.mrb[0].mxu1 %v47_v49  ;;  %v52_v26 = vld [vmem:[#allocation2 + $0x28] sm:$0xff]  ;;  %v135_v28 = vld [vmem:[#allocation5 + $0x240] sm:$0xff]  ;;  %v1384_v30 = vpack.c.bf16 %v166_v22, %v165_v21  ;;  %v153_v31 = vld [vmem:[#allocation5 + $0x2d0] sm:$0xff]  ;;  %v1386_v34 = vpack.c.bf16 %v184_v25, %v183_v24 }
  0x4b   :  { %1371 = vmatprep.subr.bf16.mxu0 %v1370_v46  ;;  %1341 = vmatpush3.bf16.msra.mxu1 %v1340_v50  ;;  %v136_v29 = vld [vmem:[#allocation5 + $0x248] sm:$0xff]  ;;  %v154_v32 = vld [vmem:[#allocation5 + $0x2d8] sm:$0xff]  ;;  %v167_v35 = vld [vmem:[#allocation5 + $0x340] sm:$0xff] }
  0x4c   :  { %1343 = vmatprep.subr.bf16.mxu1 %v1342_v53  ;;  %603 = vmatprep.mubr.f32.mxu1 %v52_v26  ;;  %v54_v33 = vld [vmem:[#allocation2 + $0x38] sm:$0xff]  ;;  %v168_v36 = vld [vmem:[#allocation5 + $0x348] sm:$0xff]  ;;  %v1356_v37 = vpack.c.bf16 %v136_v29, %v135_v28  ;;  %v185_v38 = vld [vmem:[#allocation5 + $0x3d0] sm:$0xff]  ;;  %v1358_v40 = vpack.c.bf16 %v154_v32, %v153_v31 }
  0x4d   :  { %534 = vmatmul.mubr.f32.vlgmr.msra.gmra.mrb[2].mxu0 %v49_v56  ;;  %v186_v39 = vld [vmem:[#allocation5 + $0x3d8] sm:$0xff]  ;;  %v137_v41 = vld [vmem:[#allocation5 + $0x250] sm:$0xff]  ;;  %v1388_v43 = vpack.c.bf16 %v168_v36, %v167_v35  ;;  %v155_v44 = vld [vmem:[#allocation5 + $0x2e0] sm:$0xff] }
  0x4e   :  { %1373 = vmatpush3.bf16.msra.mxu0 %v1372_v57  ;;  %673 = vmatprep.mubr.f32.mxu0 %v54_v33  ;;  %v138_v42 = vld [vmem:[#allocation5 + $0x258] sm:$0xff]  ;;  %v156_v45 = vld [vmem:[#allocation5 + $0x2e8] sm:$0xff]  ;;  %v1390_v46 = vpack.c.bf16 %v186_v39, %v185_v38  ;;  %v169_v47 = vld [vmem:[#allocation5 + $0x350] sm:$0xff] }
  0x4f   :  { %1375 = vmatprep.subr.bf16.mxu0 %v1374_v60  ;;  %1345 = vmatpush3.bf16.msra.mxu1 %v1344_v63  ;;  %v170_v48 = vld [vmem:[#allocation5 + $0x358] sm:$0xff]  ;;  %v1360_v49 = vpack.c.bf16 %v138_v42, %v137_v41  ;;  %v187_v50 = vld [vmem:[#allocation5 + $0x3e0] sm:$0xff]  ;;  %v188_v51 = vld [vmem:[#allocation5 + $0x3e8] sm:$0xff]  ;;  %v1362_v52 = vpack.c.bf16 %v156_v45, %v155_v44 }
  0x50   :  { %1347 = vmatprep.subr.bf16.mxu1 %v1346_v2  ;;  %v139_v53 = vld [vmem:[#allocation5 + $0x260] sm:$0xff]  ;;  %v140_v54 = vld [vmem:[#allocation5 + $0x268] sm:$0xff]  ;;  %v1392_v55 = vpack.c.bf16 %v170_v48, %v169_v47  ;;  %v157_v56 = vld [vmem:[#allocation5 + $0x2f0] sm:$0xff]  ;;  %v1394_v58 = vpack.c.bf16 %v188_v51, %v187_v50 }
  0x51   :  { %v158_v57 = vld [vmem:[#allocation5 + $0x2f8] sm:$0xff]  ;;  %v171_v59 = vld [vmem:[#allocation5 + $0x360] sm:$0xff]  ;;  %v172_v60 = vld [vmem:[#allocation5 + $0x368] sm:$0xff]  ;;  %v1364_v61 = vpack.c.bf16 %v140_v54, %v139_v53 }
  0x52   :  { %1377 = vmatpush3.bf16.msra.mxu0 %v1376_v5  ;;  %v189_v62 = vld [vmem:[#allocation5 + $0x3f0] sm:$0xff]  ;;  %v190_v63 = vld [vmem:[#allocation5 + $0x3f8] sm:$0xff]  ;;  %v1366_v0 = vpack.c.bf16 %v158_v57, %v157_v56  ;;  %v1396_v3 = vpack.c.bf16 %v172_v60, %v171_v59  ;;  %v207_v4 = vld [vmem:[#allocation5 + $0x480] sm:$0xff] }
  0x53   :  { %1379 = vmatprep.subr.bf16.mxu0 %v1378_v8  ;;  %1349 = vmatpush3.bf16.msra.mxu1 %v1348_v11  ;;  %v141_v1 = vld [vmem:[#allocation5 + $0x270] sm:$0xff]  ;;  %v142_v2 = vld [vmem:[#allocation5 + $0x278] sm:$0xff]  ;;  %v208_v5 = vld [vmem:[#allocation5 + $0x488] sm:$0xff]  ;;  %v1398_v6 = vpack.c.bf16 %v190_v63, %v189_v62 }
  0x54   :  { %1351 = vmatprep.subr.bf16.mxu1 %v1350_v14  ;;  %v173_v7 = vld [vmem:[#allocation5 + $0x370] sm:$0xff]  ;;  %v174_v8 = vld [vmem:[#allocation5 + $0x378] sm:$0xff]  ;;  %v1368_v9 = vpack.c.bf16 %v142_v2, %v141_v1  ;;  %v239_v10 = vld [vmem:[#allocation5 + $0x580] sm:$0xff]  ;;  %v1402_v12 = vpack.c.bf16 %v208_v5, %v207_v4 }
  0x55   :  { %v240_v11 = vld [vmem:[#allocation5 + $0x588] sm:$0xff]  ;;  %v191_v13 = vld [vmem:[#allocation5 + $0x400] sm:$0xff]  ;;  %v1400_v15 = vpack.c.bf16 %v174_v8, %v173_v7  ;;  %v209_v16 = vld [vmem:[#allocation5 + $0x490] sm:$0xff] }
  0x56   :  { %1381 = vmatpush3.bf16.msra.mxu0 %v1380_v17  ;;  %v192_v14 = vld [vmem:[#allocation5 + $0x408] sm:$0xff]  ;;  %v210_v17 = vld [vmem:[#allocation5 + $0x498] sm:$0xff]  ;;  %v1434_v18 = vpack.c.bf16 %v240_v11, %v239_v10  ;;  %v223_v19 = vld [vmem:[#allocation5 + $0x500] sm:$0xff] }
  0x57   :  { %1383 = vmatprep.subr.bf16.mxu0 %v1382_v20  ;;  %1353 = vmatpush3.bf16.msra.mxu1 %v1352_v23  ;;  %v224_v20 = vld [vmem:[#allocation5 + $0x508] sm:$0xff]  ;;  %v51_v21 = vld [vmem:[#allocation2 + $0x20] sm:$0xff]  ;;  %v1404_v22 = vpack.c.bf16 %v192_v14, %v191_v13  ;;  %v241_v23 = vld [vmem:[#allocation5 + $0x590] sm:$0xff]  ;;  %v1406_v25 = vpack.c.bf16 %v210_v17, %v209_v16 }
  0x58   :  { %1355 = vmatprep.subr.bf16.mxu1 %v1354_v27  ;;  %v242_v24 = vld [vmem:[#allocation5 + $0x598] sm:$0xff]  ;;  %v193_v26 = vld [vmem:[#allocation5 + $0x410] sm:$0xff]  ;;  %v1436_v29 = vpack.c.bf16 %v224_v20, %v223_v19  ;;  %v212_v31 = vld [vmem:[#allocation5 + $0x4a8] sm:$0xff] }
  0x59   :  { %v194_v27 = vld [vmem:[#allocation5 + $0x418] sm:$0xff]  ;;  %v53_v28 = vld [vmem:[#allocation2 + $0x30] sm:$0xff]  ;;  %v1438_v32 = vpack.c.bf16 %v242_v24, %v241_v23  ;;  %v56_v35 = vld [vmem:[#allocation2 + $0x48] sm:$0xff] }
  0x5a   :  { %1385 = vmatpush3.bf16.msra.mxu0 %v1384_v30  ;;  %v211_v30 = vld [vmem:[#allocation5 + $0x4a0] sm:$0xff]  ;;  %v225_v33 = vld [vmem:[#allocation5 + $0x510] sm:$0xff]  ;;  %v1408_v36 = vpack.c.bf16 %v194_v27, %v193_v26  ;;  %v244_v38 = vld [vmem:[#allocation5 + $0x5a8] sm:$0xff] }
  0x5b   :  { %1387 = vmatprep.subr.bf16.mxu0 %v1386_v34  ;;  %1357 = vmatpush3.bf16.msra.mxu1 %v1356_v37  ;;  %v226_v34 = vld [vmem:[#allocation5 + $0x518] sm:$0xff]  ;;  %v243_v37 = vld [vmem:[#allocation5 + $0x5a0] sm:$0xff]  ;;  %v196_v42 = vld [vmem:[#allocation5 + $0x428] sm:$0xff] }
  0x5c   :  { %1359 = vmatprep.subr.bf16.mxu1 %v1358_v40  ;;  %v58_v39 = vld [vmem:[#allocation2 + $0x58] sm:$0xff]  ;;  %v1410_v40 = vpack.c.bf16 %v212_v31, %v211_v30  ;;  %v195_v41 = vld [vmem:[#allocation5 + $0x420] sm:$0xff]  ;;  %v213_v44 = vld [vmem:[#allocation5 + $0x4b0] sm:$0xff] }
  0x5d   :  { %v214_v45 = vld [vmem:[#allocation5 + $0x4b8] sm:$0xff]  ;;  %v227_v47 = vld [vmem:[#allocation5 + $0x520] sm:$0xff]  ;;  %v228_v48 = vld [vmem:[#allocation5 + $0x528] sm:$0xff] }
  0x5e   :  { %1389 = vmatpush3.bf16.msra.mxu0 %v1388_v43  ;;  %v1440_v43 = vpack.c.bf16 %v226_v34, %v225_v33  ;;  %v245_v50 = vld [vmem:[#allocation5 + $0x5b0] sm:$0xff]  ;;  %v246_v51 = vld [vmem:[#allocation5 + $0x5b8] sm:$0xff]  ;;  %v215_v56 = vld [vmem:[#allocation5 + $0x4c0] sm:$0xff] }
  0x5f   :  { %1391 = vmatprep.subr.bf16.mxu0 %v1390_v46  ;;  %1361 = vmatpush3.bf16.msra.mxu1 %v1360_v49  ;;  %v1442_v46 = vpack.c.bf16 %v244_v38, %v243_v37  ;;  %v1412_v49 = vpack.c.bf16 %v196_v42, %v195_v41  ;;  %v197_v53 = vld [vmem:[#allocation5 + $0x430] sm:$0xff]  ;;  %v198_v54 = vld [vmem:[#allocation5 + $0x438] sm:$0xff]  ;;  %v216_v57 = vld [vmem:[#allocation5 + $0x4c8] sm:$0xff] }
  0x60   :  { %1363 = vmatprep.subr.bf16.mxu1 %v1362_v52  ;;  %v1414_v52 = vpack.c.bf16 %v214_v45, %v213_v44  ;;  %v229_v59 = vld [vmem:[#allocation5 + $0x530] sm:$0xff]  ;;  %v230_v60 = vld [vmem:[#allocation5 + $0x538] sm:$0xff]  ;;  %v247_v62 = vld [vmem:[#allocation5 + $0x5c0] sm:$0xff] }
  0x61   :  { %v248_v63 = vld [vmem:[#allocation5 + $0x5c8] sm:$0xff]  ;;  %v199_v1 = vld [vmem:[#allocation5 + $0x440] sm:$0xff]  ;;  %v217_v4 = vld [vmem:[#allocation5 + $0x4d0] sm:$0xff] }
  0x62   :  { %1393 = vmatpush3.bf16.msra.mxu0 %v1392_v55  ;;  %v1444_v55 = vpack.c.bf16 %v228_v48, %v227_v47  ;;  %v200_v2 = vld [vmem:[#allocation5 + $0x448] sm:$0xff]  ;;  %v218_v5 = vld [vmem:[#allocation5 + $0x4d8] sm:$0xff]  ;;  %v231_v7 = vld [vmem:[#allocation5 + $0x540] sm:$0xff] }
  0x63   :  { %1395 = vmatprep.subr.bf16.mxu0 %v1394_v58  ;;  %1365 = vmatpush3.bf16.msra.mxu1 %v1364_v61  ;;  %v1446_v58 = vpack.c.bf16 %v246_v51, %v245_v50  ;;  %v1416_v61 = vpack.c.bf16 %v198_v54, %v197_v53  ;;  %v232_v8 = vld [vmem:[#allocation5 + $0x548] sm:$0xff]  ;;  %v249_v10 = vld [vmem:[#allocation5 + $0x5d0] sm:$0xff]  ;;  %v250_v11 = vld [vmem:[#allocation5 + $0x5d8] sm:$0xff] }
  0x64   :  { %1367 = vmatprep.subr.bf16.mxu1 %v1366_v0  ;;  %v1418_v0 = vpack.c.bf16 %v216_v57, %v215_v56  ;;  %v201_v13 = vld [vmem:[#allocation5 + $0x450] sm:$0xff]  ;;  %v202_v14 = vld [vmem:[#allocation5 + $0x458] sm:$0xff]  ;;  %v219_v16 = vld [vmem:[#allocation5 + $0x4e0] sm:$0xff] }
  0x65   :  { %v220_v17 = vld [vmem:[#allocation5 + $0x4e8] sm:$0xff]  ;;  %v233_v19 = vld [vmem:[#allocation5 + $0x550] sm:$0xff]  ;;  %v234_v20 = vld [vmem:[#allocation5 + $0x558] sm:$0xff] }
  0x66   :  { %1397 = vmatpush3.bf16.msra.mxu0 %v1396_v3  ;;  %v1448_v3 = vpack.c.bf16 %v230_v60, %v229_v59  ;;  %v252_v23 = vld [vmem:[#allocation5 + $0x5e8] sm:$0xff]  ;;  %v1426_v24 = vpack.c.bf16 %v220_v17, %v219_v16  ;;  %v1456_v27 = vpack.c.bf16 %v234_v20, %v233_v19  ;;  %v235_v31 = vld [vmem:[#allocation5 + $0x560] sm:$0xff]  ;;  %v253_v34 = vld [vmem:[#allocation5 + $0x5f0] sm:$0xff] }
  0x67   :  { %1399 = vmatprep.subr.bf16.mxu0 %v1398_v6  ;;  %1369 = vmatpush3.bf16.msra.mxu1 %v1368_v9  ;;  %v1450_v6 = vpack.c.bf16 %v248_v63, %v247_v62  ;;  %v1420_v9 = vpack.c.bf16 %v200_v2, %v199_v1  ;;  %v204_v26 = vld [vmem:[#allocation5 + $0x468] sm:$0xff]  ;;  %v205_v37 = vld [vmem:[#allocation5 + $0x470] sm:$0xff]  ;;  %v206_v38 = vld [vmem:[#allocation5 + $0x478] sm:$0xff] }
  0x68   :  { %1403 = vmatprep.subr.bf16.mxu1 %v1402_v12  ;;  %v1422_v12 = vpack.c.bf16 %v218_v5, %v217_v4  ;;  %v272_v41 = vld [vmem:[#allocation5 + $0x688] sm:$0xff]  ;;  %v238_v44 = vld [vmem:[#allocation5 + $0x578] sm:$0xff]  ;;  %v1432_v45 = vpack.c.bf16 %v206_v38, %v205_v37  ;;  %v55_v57 = vld [vmem:[#allocation2 + $0x40] sm:$0xff] }
  0x69   :  { %v304_v47 = vld [vmem:[#allocation5 + $0x788] sm:$0xff]  ;;  %v274_v53 = vld [vmem:[#allocation5 + $0x698] sm:$0xff]  ;;  %v305_v59 = vld [vmem:[#allocation5 + $0x790] sm:$0xff] }
  0x6a   :  { %1401 = vmatpush3.bf16.msra.mxu0 %v1400_v15  ;;  %604 = vmatmul.mubr.f32.vlgmr.msra.gmra.mrb[2].mxu1 %v51_v21  ;;  %v1452_v15 = vpack.c.bf16 %v232_v8, %v231_v7  ;;  %v1424_v21 = vpack.c.bf16 %v202_v14, %v201_v13  ;;  %v256_v50 = vld [vmem:[#allocation5 + $0x608] sm:$0xff]  ;;  %v306_v60 = vld [vmem:[#allocation5 + $0x798] sm:$0xff]  ;;  %v257_v62 = vld [vmem:[#allocation5 + $0x610] sm:$0xff] }
  0x6b   :  { %1435 = vmatprep.subr.bf16.mxu0 %v1434_v18  ;;  %1405 = vmatpush3.bf16.msra.mxu1 %v1404_v22  ;;  %v1454_v18 = vpack.c.bf16 %v250_v11, %v249_v10  ;;  %v251_v22 = vld [vmem:[#allocation5 + $0x5e0] sm:$0xff]  ;;  %v288_v56 = vld [vmem:[#allocation5 + $0x708] sm:$0xff]  ;;  %v258_v63 = vld [vmem:[#allocation5 + $0x618] sm:$0xff]  ;;  %v1502_v5 = vpack.c.bf16 %v306_v60, %v305_v59 }
  0x6c   :  { %743 = vmatprep.mubr.f32.mxu1 %v56_v35  ;;  %1407 = vmatprep.subr.bf16.mxu1 %v1406_v25  ;;  %v203_v25 = vld [vmem:[#allocation5 + $0x460] sm:$0xff]  ;;  %v1458_v30 = vpack.c.bf16 %v252_v23, %v251_v22  ;;  %v254_v35 = vld [vmem:[#allocation5 + $0x5f8] sm:$0xff]  ;;  %v57_v1 = vld [vmem:[#allocation2 + $0x50] sm:$0xff] }
  0x6d   :  { %674 = vmatmul.mubr.f32.vlgmr.msra.gmra.mrb[4].mxu0 %v53_v28  ;;  %v221_v28 = vld [vmem:[#allocation5 + $0x4f0] sm:$0xff]  ;;  %v1428_v33 = vpack.c.bf16 %v204_v26, %v203_v25  ;;  %v1462_v42 = vpack.c.bf16 %v254_v35, %v253_v34  ;;  %v276_v4 = vld [vmem:[#allocation5 + $0x6a8] sm:$0xff]  ;;  %v290_v7 = vld [vmem:[#allocation5 + $0x718] sm:$0xff] }
  0x6e   :  { %1437 = vmatpush3.bf16.msra.mxu0 %v1436_v29  ;;  %813 = vmatprep.mubr.f32.mxu0 %v58_v39  ;;  %v222_v29 = vld [vmem:[#allocation5 + $0x4f8] sm:$0xff]  ;;  %v307_v10 = vld [vmem:[#allocation5 + $0x7a0] sm:$0xff]  ;;  %v308_v11 = vld [vmem:[#allocation5 + $0x7a8] sm:$0xff] }
  0x6f   :  { %1439 = vmatprep.subr.bf16.mxu0 %v1438_v32  ;;  %1409 = vmatpush3.bf16.msra.mxu1 %v1408_v36  ;;  %v236_v32 = vld [vmem:[#allocation5 + $0x568] sm:$0xff]  ;;  %v1430_v36 = vpack.c.bf16 %v222_v29, %v221_v28  ;;  %v62_v8 = vld [vmem:[#allocation2 + $0x78] sm:$0xff]  ;;  %v259_v13 = vld [vmem:[#allocation5 + $0x620] sm:$0xff] }
  0x70   :  { %1411 = vmatprep.subr.bf16.mxu1 %v1410_v40  ;;  %v1460_v39 = vpack.c.bf16 %v236_v32, %v235_v31  ;;  %v271_v40 = vld [vmem:[#allocation5 + $0x680] sm:$0xff]  ;;  %v260_v14 = vld [vmem:[#allocation5 + $0x628] sm:$0xff]  ;;  %v277_v16 = vld [vmem:[#allocation5 + $0x6b0] sm:$0xff] }
  0x71   :  { %v1466_v48 = vpack.c.bf16 %v272_v41, %v271_v40  ;;  %v278_v17 = vld [vmem:[#allocation5 + $0x6b8] sm:$0xff]  ;;  %v291_v19 = vld [vmem:[#allocation5 + $0x720] sm:$0xff]  ;;  %v292_v20 = vld [vmem:[#allocation5 + $0x728] sm:$0xff] }
  0x72   :  { %1441 = vmatpush3.bf16.msra.mxu0 %v1440_v43  ;;  %v237_v43 = vld [vmem:[#allocation5 + $0x570] sm:$0xff]  ;;  %v310_v23 = vld [vmem:[#allocation5 + $0x7b8] sm:$0xff]  ;;  %v279_v28 = vld [vmem:[#allocation5 + $0x6c0] sm:$0xff] }
  0x73   :  { %1443 = vmatprep.subr.bf16.mxu0 %v1442_v46  ;;  %1413 = vmatpush3.bf16.msra.mxu1 %v1412_v49  ;;  %v303_v46 = vld [vmem:[#allocation5 + $0x780] sm:$0xff]  ;;  %v1464_v51 = vpack.c.bf16 %v238_v44, %v237_v43  ;;  %v309_v22 = vld [vmem:[#allocation5 + $0x7b0] sm:$0xff]  ;;  %v262_v26 = vld [vmem:[#allocation5 + $0x638] sm:$0xff] }
  0x74   :  { %1415 = vmatprep.subr.bf16.mxu1 %v1414_v52  ;;  %v255_v49 = vld [vmem:[#allocation5 + $0x600] sm:$0xff]  ;;  %v273_v52 = vld [vmem:[#allocation5 + $0x690] sm:$0xff]  ;;  %v1498_v54 = vpack.c.bf16 %v304_v47, %v303_v46  ;;  %v280_v29 = vld [vmem:[#allocation5 + $0x6c8] sm:$0xff] }
  0x75   :  { %v261_v25 = vld [vmem:[#allocation5 + $0x630] sm:$0xff]  ;;  %v294_v32 = vld [vmem:[#allocation5 + $0x738] sm:$0xff]  ;;  %v311_v34 = vld [vmem:[#allocation5 + $0x7c0] sm:$0xff] }
  0x76   :  { %1445 = vmatpush3.bf16.msra.mxu0 %v1444_v55  ;;  %v287_v55 = vld [vmem:[#allocation5 + $0x700] sm:$0xff]  ;;  %v293_v31 = vld [vmem:[#allocation5 + $0x730] sm:$0xff]  ;;  %v312_v35 = vld [vmem:[#allocation5 + $0x7c8] sm:$0xff] }
  0x77   :  { %1447 = vmatprep.subr.bf16.mxu0 %v1446_v58  ;;  %1417 = vmatpush3.bf16.msra.mxu1 %v1416_v61  ;;  %v1468_v58 = vpack.c.bf16 %v256_v50, %v255_v49  ;;  %v1470_v61 = vpack.c.bf16 %v274_v53, %v273_v52  ;;  %v1500_v2 = vpack.c.bf16 %v288_v56, %v287_v55  ;;  %v263_v37 = vld [vmem:[#allocation5 + $0x640] sm:$0xff]  ;;  %v264_v38 = vld [vmem:[#allocation5 + $0x648] sm:$0xff]  ;;  %v281_v40 = vld [vmem:[#allocation5 + $0x6d0] sm:$0xff] }
  0x78   :  { %1419 = vmatprep.subr.bf16.mxu1 %v1418_v0  ;;  %v60_v0 = vld [vmem:[#allocation2 + $0x68] sm:$0xff]  ;;  %v282_v41 = vld [vmem:[#allocation5 + $0x6d8] sm:$0xff]  ;;  %v295_v43 = vld [vmem:[#allocation5 + $0x740] sm:$0xff] }
  0x79   :  { %v296_v44 = vld [vmem:[#allocation5 + $0x748] sm:$0xff]  ;;  %v313_v46 = vld [vmem:[#allocation5 + $0x7d0] sm:$0xff]  ;;  %v314_v47 = vld [vmem:[#allocation5 + $0x7d8] sm:$0xff] }
  0x7a   :  { %1449 = vmatpush3.bf16.msra.mxu0 %v1448_v3  ;;  %v275_v3 = vld [vmem:[#allocation5 + $0x6a0] sm:$0xff]  ;;  %v265_v49 = vld [vmem:[#allocation5 + $0x650] sm:$0xff]  ;;  %v266_v50 = vld [vmem:[#allocation5 + $0x658] sm:$0xff] }
  0x7b   :  { %1451 = vmatprep.subr.bf16.mxu0 %v1450_v6  ;;  %1421 = vmatpush3.bf16.msra.mxu1 %v1420_v9  ;;  %v289_v6 = vld [vmem:[#allocation5 + $0x710] sm:$0xff]  ;;  %v1472_v9 = vpack.c.bf16 %v258_v63, %v257_v62  ;;  %v283_v52 = vld [vmem:[#allocation5 + $0x6e0] sm:$0xff]  ;;  %v284_v53 = vld [vmem:[#allocation5 + $0x6e8] sm:$0xff] }
  0x7c   :  { %1423 = vmatprep.subr.bf16.mxu1 %v1422_v12  ;;  %v1474_v12 = vpack.c.bf16 %v276_v4, %v275_v3  ;;  %v297_v55 = vld [vmem:[#allocation5 + $0x750] sm:$0xff]  ;;  %v298_v56 = vld [vmem:[#allocation5 + $0x758] sm:$0xff]  ;;  %v316_v59 = vld [vmem:[#allocation5 + $0x7e8] sm:$0xff]  ;;  %v1490_v60 = vpack.c.bf16 %v284_v53, %v283_v52 }
  0x7d   :  { %v268_v62 = vld [vmem:[#allocation5 + $0x668] sm:$0xff]  ;;  %v1520_v63 = vpack.c.bf16 %v298_v56, %v297_v55  ;;  %v299_v3 = vld [vmem:[#allocation5 + $0x760] sm:$0xff] }
  0x7e   :  { %1453 = vmatpush3.bf16.msra.mxu0 %v1452_v15  ;;  %v1504_v15 = vpack.c.bf16 %v290_v7, %v289_v6  ;;  %v300_v4 = vld [vmem:[#allocation5 + $0x768] sm:$0xff]  ;;  %v317_v6 = vld [vmem:[#allocation5 + $0x7f0] sm:$0xff]  ;;  %v318_v7 = vld [vmem:[#allocation5 + $0x7f8] sm:$0xff] }
  0x7f   :  { %1455 = vmatprep.subr.bf16.mxu0 %v1454_v18  ;;  %1425 = vmatpush3.bf16.msra.mxu1 %v1424_v21  ;;  %v1506_v18 = vpack.c.bf16 %v308_v11, %v307_v10  ;;  %v1476_v21 = vpack.c.bf16 %v260_v14, %v259_v13  ;;  %v270_v10 = vld [vmem:[#allocation5 + $0x678] sm:$0xff]  ;;  %v1524_v11 = vpack.c.bf16 %v300_v4, %v299_v3  ;;  %v301_v13 = vld [vmem:[#allocation5 + $0x770] sm:$0xff]  ;;  %v986_v52 = vld [vmem:[%s1702_s4] ss:$0 sm:$0xff] }
  0x80   :  { %1427 = vmatprep.subr.bf16.mxu1 %v1426_v24  ;;  %v1478_v24 = vpack.c.bf16 %v278_v17, %v277_v16  ;;  %v302_v14 = vld [vmem:[#allocation5 + $0x778] sm:$0xff]  ;;  %v59_v17 = vld [vmem:[#allocation2 + $0x60] sm:$0xff] }
  0x81   :  { %v1528_v16 = vpack.c.bf16 %v302_v14, %v301_v13 }
  0x82   :  { %1457 = vmatpush3.bf16.msra.mxu0 %v1456_v27  ;;  %v1508_v27 = vpack.c.bf16 %v292_v20, %v291_v19 }
  0x83   :  { %1459 = vmatprep.subr.bf16.mxu0 %v1458_v30  ;;  %1429 = vmatpush3.bf16.msra.mxu1 %v1428_v33  ;;  %v1510_v30 = vpack.c.bf16 %v310_v23, %v309_v22  ;;  %v1480_v33 = vpack.c.bf16 %v262_v26, %v261_v25 }
  0x84   :  { %1431 = vmatprep.subr.bf16.mxu1 %v1430_v36  ;;  %v1482_v36 = vpack.c.bf16 %v280_v29, %v279_v28 }
  0x86   :  { %1461 = vmatpush3.bf16.msra.mxu0 %v1460_v39  ;;  %v1512_v39 = vpack.c.bf16 %v294_v32, %v293_v31 }
  0x87   :  { %1463 = vmatprep.subr.bf16.mxu0 %v1462_v42  ;;  %1433 = vmatpush3.bf16.msra.mxu1 %v1432_v45  ;;  %v1514_v42 = vpack.c.bf16 %v312_v35, %v311_v34  ;;  %v1484_v45 = vpack.c.bf16 %v264_v38, %v263_v37 }
  0x88   :  { %1467 = vmatprep.subr.bf16.mxu1 %v1466_v48  ;;  %v1486_v48 = vpack.c.bf16 %v282_v41, %v281_v40 }
  0x8a   :  { %1465 = vmatpush3.bf16.msra.mxu0 %v1464_v51  ;;  %744 = vmatmul.mubr.f32.vlgmr.msra.gmra.mrb[4].mxu1 %v55_v57  ;;  %v1516_v51 = vpack.c.bf16 %v296_v44, %v295_v43  ;;  %v1488_v57 = vpack.c.bf16 %v266_v50, %v265_v49 }
  0x8b   :  { %1499 = vmatprep.subr.bf16.mxu0 %v1498_v54  ;;  %1469 = vmatpush3.bf16.msra.mxu1 %v1468_v58  ;;  %v1518_v54 = vpack.c.bf16 %v314_v47, %v313_v46  ;;  %v315_v58 = vld [vmem:[#allocation5 + $0x7e0] sm:$0xff] }
  0x8c   :  { %883 = vmatprep.mubr.f32.mxu1 %v60_v0  ;;  %1471 = vmatprep.subr.bf16.mxu1 %v1470_v61  ;;  %v267_v61 = vld [vmem:[#allocation5 + $0x660] sm:$0xff]  ;;  %v285_v0 = vld [vmem:[#allocation5 + $0x6f0] sm:$0xff] }
  0x8d   :  { %814 = vmatmul.mubr.f32.vlgmr.msra.gmra.mrb[6].mxu0 %v57_v1  ;;  %v286_v1 = vld [vmem:[#allocation5 + $0x6f8] sm:$0xff] }
  0x8e   :  { %1501 = vmatpush3.bf16.msra.mxu0 %v1500_v2  ;;  %953 = vmatprep.mubr.f32.mxu0 %v62_v8  ;;  %v1522_v2 = vpack.c.bf16 %v316_v59, %v315_v58  ;;  %v1494_v8 = vpack.c.bf16 %v286_v1, %v285_v0 }
  0x8f   :  { %1503 = vmatprep.subr.bf16.mxu0 %v1502_v5  ;;  %1473 = vmatpush3.bf16.msra.mxu1 %v1472_v9  ;;  %v1492_v5 = vpack.c.bf16 %v268_v62, %v267_v61  ;;  %v269_v9 = vld [vmem:[#allocation5 + $0x670] sm:$0xff] }
  0x90   :  { %1475 = vmatprep.subr.bf16.mxu1 %v1474_v12  ;;  %v1526_v12 = vpack.c.bf16 %v318_v7, %v317_v6 }
  0x92   :  { %1505 = vmatpush3.bf16.msra.mxu0 %v1504_v15  ;;  %v1496_v15 = vpack.c.bf16 %v270_v10, %v269_v9 }
  0x93   :  { %1507 = vmatprep.subr.bf16.mxu0 %v1506_v18  ;;  %1477 = vmatpush3.bf16.msra.mxu1 %v1476_v21  ;;  %v61_v18 = vld [vmem:[#allocation2 + $0x70] sm:$0xff] }
  0x94   :  { %1479 = vmatprep.subr.bf16.mxu1 %v1478_v24 }
  0x96   :  { %1509 = vmatpush3.bf16.msra.mxu0 %v1508_v27 }
  0x97   :  { %1511 = vmatprep.subr.bf16.mxu0 %v1510_v30  ;;  %1481 = vmatpush3.bf16.msra.mxu1 %v1480_v33 }
  0x98   :  { %1483 = vmatprep.subr.bf16.mxu1 %v1482_v36 }
  0x9a   :  { %1513 = vmatpush3.bf16.msra.mxu0 %v1512_v39 }
  0x9b   :  { %1515 = vmatprep.subr.bf16.mxu0 %v1514_v42  ;;  %1485 = vmatpush3.bf16.msra.mxu1 %v1484_v45 }
  0x9c   :  { %1487 = vmatprep.subr.bf16.mxu1 %v1486_v48 }
  0x9e   :  { %1517 = vmatpush3.bf16.msra.mxu0 %v1516_v51 }
  0x9f   :  { %1519 = vmatprep.subr.bf16.mxu0 %v1518_v54  ;;  %1489 = vmatpush3.bf16.msra.mxu1 %v1488_v57 }
  0xa0   :  { %1491 = vmatprep.subr.bf16.mxu1 %v1490_v60 }
  0xa2   :  { %1521 = vmatpush3.bf16.msra.mxu0 %v1520_v63 }
  0xa3   :  { %1523 = vmatprep.subr.bf16.mxu0 %v1522_v2  ;;  %1493 = vmatpush3.bf16.msra.mxu1 %v1492_v5 }
  0xa4   :  { %1495 = vmatprep.subr.bf16.mxu1 %v1494_v8 }
  0xa6   :  { %1525 = vmatpush3.bf16.msra.mxu0 %v1524_v11 }
  0xa7   :  { %1527 = vmatprep.subr.bf16.mxu0 %v1526_v12  ;;  %1497 = vmatpush3.bf16.msra.mxu1 %v1496_v15 }
  0xaa   :  { %1529 = vmatpush3.bf16.msra.mxu0 %v1528_v16  ;;  %884 = vmatmul.mubr.f32.vlgmr.msra.gmra.mrb[6].mxu1 %v59_v17 }
  0xad   :  { %954 = vmatmul.mubr.f32.vlgmr.msra.gmra.mrb[8].mxu0 %v61_v18 }
  0xfe   :  { %v395_v19 = vpop.f32.mrb[0].mxu0 }
  0xff   :  { %v1273_v20 = vpop.f32.mrb[1].mxu0 }
 0x11d   :  { %v1021_v21 = vpop.f32.mrb[0].mxu1 }
 0x11e   :  { %v1022_v22 = vpop.f32.mrb[1].mxu1 }
 0x11f   :  { %v1023_v23 = vadd.f32 %v1022_v22, %v1021_v21 }
 0x120   :  { %v1056_v24 = vpop.f32.mrb[2].mxu0 }
 0x121   :  { %v1057_v25 = vpop.f32.mrb[3].mxu0  ;;  %v466_v26 = vadd.f32 %v1023_v23, %v395_v19 }
 0x122   :  { %v1058_v27 = vadd.f32 %v1057_v25, %v1056_v24 }
 0x124   :  { %v536_v28 = vadd.f32 %v1058_v27, %v466_v26 }
 0x13d   :  { %v1091_v29 = vpop.f32.mrb[2].mxu1 }
 0x13e   :  { %v1092_v30 = vpop.f32.mrb[3].mxu1 }
 0x13f   :  { %v1093_v31 = vadd.f32 %v1092_v30, %v1091_v29 }
 0x140   :  { %v1126_v32 = vpop.f32.mrb[4].mxu0 }
 0x141   :  { %v1127_v33 = vpop.f32.mrb[5].mxu0  ;;  %v606_v34 = vadd.f32 %v1093_v31, %v536_v28 }
 0x142   :  { %v1128_v35 = vadd.f32 %v1127_v33, %v1126_v32 }
 0x144   :  { %v676_v36 = vadd.f32 %v1128_v35, %v606_v34 }
 0x15d   :  { %v1161_v37 = vpop.f32.mrb[4].mxu1 }
 0x15e   :  { %v1162_v38 = vpop.f32.mrb[5].mxu1 }
 0x15f   :  { %v1163_v39 = vadd.f32 %v1162_v38, %v1161_v37 }
 0x160   :  { %v1196_v40 = vpop.f32.mrb[6].mxu0 }
 0x161   :  { %v1197_v41 = vpop.f32.mrb[7].mxu0  ;;  %v746_v42 = vadd.f32 %v1163_v39, %v676_v36 }
 0x162   :  { %v1198_v43 = vadd.f32 %v1197_v41, %v1196_v40 }
 0x164   :  { %v816_v44 = vadd.f32 %v1198_v43, %v746_v42 }
 0x17d   :  { %v1231_v45 = vpop.f32.mrb[6].mxu1 }
 0x17e   :  { %v1232_v46 = vpop.f32.mrb[7].mxu1 }
 0x17f   :  { %v1233_v47 = vadd.f32 %v1232_v46, %v1231_v45 }
 0x180   :  { %v1266_v48 = vpop.f32.mrb[8].mxu0 }
 0x181   :  { %v1267_v49 = vpop.f32.mrb[9].mxu0  ;;  %v886_v50 = vadd.f32 %v1233_v47, %v816_v44 }
 0x182   :  { %v1268_v51 = vadd.f32 %v1267_v49, %v1266_v48 }
 0x184   :  { %v956_v53 = vadd.f32 %v1268_v51, %v886_v50 }
 0x186   :  { %v966_v54 = vadd.f32 %v986_v52, %v956_v53 }
 0x188   :  { %967 = vst [vmem:[#allocation7] sm:$0xff] %v966_v54 }
 0x189   :  { %1592 = shalt.err (!%p1589_p6)
}
 0x18a   :  { %s1593_s26 = scalar_lea.hbm %s1703_s5, 128 }
 0x18b   :  { %p1594_p7 = scmp.ne.s32.totalorder %s1703_s5, %s1593_s26  ;;  %p1597_p8 = scmp.lt.u32.totalorder %s1593_s26, %s1703_s5 }
 0x18d   :  { %p1599_p9 = pnand %p1597_p8, %p1594_p7 }
 0x18f   :  { %1602 = shalt.err (!%p1599_p9)
}
 0x190   :  { %977 = dma.vmem_to_hbm [thread:$0]  %s975_s22, 128, %s1703_s5, [#allocation4]  }
 0x191   :  { %1607 = dma.done.wait [#allocation4], 128  }
 0x192   :  { %1608 = vsyncadd [#allocation4], 4294967168 }
 0x193   :  { %981 = vsyncpa [#allocation3], 1 }
 0x194   :  { %982 = vsyncpa [#allocation6], 1 }
 0x195   :  { %983 = vsyncpa [#allocation4], 1 }

</bundles_post_ra>
